<compile_context>
chip_gen: v7x
topology: tpu7x:2x2x1
jax: 0.10.0
libtpu: 0.0.40
codegen_flags: <defaults>
</compile_context>

<pallas_src>
import functools
from collections import namedtuple

import numpy as np
import jax
import jax.numpy as jnp
from jax.experimental import pallas as pl
from jax.experimental.pallas import tpu as pltpu

_BN_EPS = 1e-5
_VMEM_LIMIT = 48 * 1024 * 1024      # <= v7x 64 MiB/TC with headroom
_ROW_TILE = 256                     # activation / matmul-M row tile


def _round_up(x, m):
    return (x + m - 1) // m * m


def _pick_row_tile(m):
    if m >= _ROW_TILE:
        return _round_up(m, _ROW_TILE), _ROW_TILE
    mp = _round_up(m, 16)
    return mp, mp


def _cp(dims):
    return pltpu.CompilerParams(dimension_semantics=dims,
                                vmem_limit_bytes=_VMEM_LIMIT)


# ----------------------------------------------------------------------------
# Grid-rows activation layout helpers
#   dense [N,OH,OW,C]  <->  flat [round_up(N*(OH+2)*(OW+2), 256), C] bf16 with
#   zeros everywhere outside the valid OHxOW region of each (OH+2)x(OW+2) image.
# ----------------------------------------------------------------------------
GridAct = namedtuple("GridAct", ["rows", "n", "oh", "ow"])


def to_grid(x_dense):
    n, oh, ow, c = x_dense.shape
    g = jnp.pad(x_dense, ((0, 0), (0, 2), (0, 2), (0, 0)))
    g = g.reshape(n * (oh + 2) * (ow + 2), c)
    rows = _round_up(g.shape[0], _ROW_TILE)
    g = jnp.pad(g, ((0, rows - g.shape[0]), (0, 0)))
    return GridAct(g.astype(jnp.bfloat16), n, oh, ow)


def from_grid(g):
    gh, gw = g.oh + 2, g.ow + 2
    c = g.rows.shape[1]
    return g.rows[: g.n * gh * gw].reshape(g.n, gh, gw, c)[:, : g.oh, : g.ow, :]


def _grid_mask(n, oh, ow, rows):
    """1.0 at valid output pixels of the grid-rows layout, 0.0 elsewhere."""
    gh, gw = oh + 2, ow + 2
    m = np.zeros((n, gh, gw), np.float32)
    m[:, :oh, :ow] = 1.0
    out = np.zeros((rows, 1), np.float32)
    out[: m.size, 0] = m.reshape(-1)
    return jnp.asarray(out)


def _dense_mask(total, rows):
    out = np.zeros((rows, 1), np.float32)
    out[:total, 0] = 1.0
    return jnp.asarray(out)


# ----------------------------------------------------------------------------
# Tiled bf16 matmul (MXU) with f32 VMEM accumulator
# ----------------------------------------------------------------------------
def _matmul_kernel(a_ref, b_ref, o_ref, acc_ref):
    @pl.when(pl.program_id(1) == 0)
    def _():
        acc_ref[...] = jnp.zeros_like(acc_ref)

    acc_ref[...] += jnp.dot(a_ref[...], b_ref[...],
                            preferred_element_type=jnp.float32)

    @pl.when(pl.program_id(1) == pl.num_programs(1) - 1)
    def _():
        o_ref[...] = acc_ref[...].astype(o_ref.dtype)


def _matmul_bias_kernel(a_ref, b_ref, bias_ref, o_ref, acc_ref):
    @pl.when(pl.program_id(1) == 0)
    def _():
        acc_ref[...] = jnp.zeros_like(acc_ref)

    acc_ref[...] += jnp.dot(a_ref[...], b_ref[...],
                            preferred_element_type=jnp.float32)

    @pl.when(pl.program_id(1) == pl.num_programs(1) - 1)
    def _():
        o_ref[...] = (acc_ref[...] + bias_ref[...]).astype(o_ref.dtype)


def matmul_rows(a, b, bias=None, out_dtype=jnp.bfloat16):
    """[M,K] @ [K,Cout], grid over (M tiles, K tiles); Cout kept whole (<=512)."""
    m, k = a.shape
    cout = b.shape[1]
    mp, tm = _pick_row_tile(m)
    kp = _round_up(k, 128)
    tk = next(t for t in (512, 256, 128) if kp % t == 0)
    a = jnp.pad(a.astype(jnp.bfloat16), ((0, mp - m), (0, kp - k)))
    b = jnp.pad(b.astype(jnp.bfloat16), ((0, kp - k), (0, 0)))
    in_specs = [pl.BlockSpec((tm, tk), lambda i, kk: (i, kk)),
                pl.BlockSpec((tk, cout), lambda i, kk: (kk, 0))]
    args = [a, b]
    kernel = _matmul_kernel
    if bias is not None:
        in_specs.append(pl.BlockSpec((1, cout), lambda i, kk: (0, 0)))
        args.append(bias.astype(jnp.float32))
        kernel = _matmul_bias_kernel
    return pl.pallas_call(
        kernel,
        out_shape=jax.ShapeDtypeStruct((mp, cout), out_dtype),
        grid=(mp // tm, kp // tk),
        in_specs=in_specs,
        out_specs=pl.BlockSpec((tm, cout), lambda i, kk: (i, 0)),
        scratch_shapes=[pltpu.VMEM((tm, cout), jnp.float32)],
        compiler_params=_cp(("parallel", "arbitrary")),
    )(*args)


# ----------------------------------------------------------------------------
# Direct 3x3 stride-1 conv on grid-rows layout (no im2col in HBM)
#   One halo DMA per row-tile (double-buffered across grid steps), 9 shifted
#   VMEM slices -> 9 MXU matmuls into an f32 accumulator.  Epilogue writes the
#   bf16 conv output and masked per-tile channel sum / sum-of-squares (fused BN
#   statistics side output).
# ----------------------------------------------------------------------------
def _conv_tap_kernel(a_hbm, w_ref, m_ref, y_ref, st_ref, a_buf, sem, acc_ref, *,
                     row_tile, dma_rows, tap_starts):
    i = pl.program_id(0)
    nt = pl.num_programs(0)

    def _start(block, slot):
        pltpu.make_async_copy(
            a_hbm.at[pl.ds(block * row_tile, dma_rows), :],
            a_buf.at[slot], sem.at[slot]).start()

    @pl.when(i == 0)
    def _():
        _start(0, 0)

    slot = i % 2
    pltpu.make_async_copy(
        a_hbm.at[pl.ds(0, dma_rows), :], a_buf.at[slot], sem.at[slot]).wait()

    # prefetch next row tile while this one computes (grid axis is sequential)
    @pl.when(i + 1 < nt)
    def _():
        _start(i + 1, 1 - slot)

    acc_ref[...] = jnp.zeros_like(acc_ref)
    cur = a_buf.at[slot]
    for t, s in enumerate(tap_starts):          # static unrolled 3x3 taps
        acc_ref[...] += jnp.dot(cur[pl.ds(s, row_tile), :], w_ref[t],
                                preferred_element_type=jnp.float32)

    acc = acc_ref[...]
    y_ref[...] = acc.astype(y_ref.dtype)
    am = acc * m_ref[...]                        # mask garbage / pad-ring rows
    st_ref[...] = jnp.concatenate(
        [jnp.sum(am, axis=0, keepdims=True),
         jnp.sum(am * am, axis=0, keepdims=True)], axis=0)[None]


def conv3x3_s1(g, w):
    n, oh, ow = g.n, g.oh, g.ow
    cin = g.rows.shape[1]
    cout = w.shape[-1]
    gw = ow + 2
    rows = g.rows.shape[0]
    nt = rows // _ROW_TILE
    halo = _round_up(2 * gw + 2, 8)
    dma_rows = _ROW_TILE + halo
    # prologue of gw+1 zero rows makes all (kh-1)*gw+(kw-1) tap offsets >= 0
    a_prep = jnp.pad(g.rows, ((gw + 1, halo), (0, 0)))
    wt = w.astype(jnp.bfloat16).reshape(9, cin, cout)
    mask = _grid_mask(n, oh, ow, rows)
    tap_starts = tuple(kh * gw + kw for kh in range(3) for kw in range(3))
    kern = functools.partial(_conv_tap_kernel, row_tile=_ROW_TILE,
                             dma_rows=dma_rows, tap_starts=tap_starts)
    y, st = pl.pallas_call(
        kern,
        out_shape=(jax.ShapeDtypeStruct((rows, cout), jnp.bfloat16),
                   jax.ShapeDtypeStruct((nt, 2, cout), jnp.float32)),
        grid=(nt,),
        in_specs=[pl.BlockSpec(memory_space=pl.ANY),                 # halo DMA source
                  pl.BlockSpec((9, cin, cout), lambda i: (0, 0, 0)),
                  pl.BlockSpec((_ROW_TILE, 1), lambda i: (i, 0))],
        out_specs=(pl.BlockSpec((_ROW_TILE, cout), lambda i: (i, 0)),
                   pl.BlockSpec((1, 2, cout), lambda i: (i, 0, 0))),
        scratch_shapes=[pltpu.VMEM((2, dma_rows, cin), jnp.bfloat16),
                        pltpu.SemaphoreType.DMA((2,)),
                        pltpu.VMEM((_ROW_TILE, cout), jnp.float32)],
        # "arbitrary": the manual cross-step DMA prefetch needs a sequential grid
        compiler_params=_cp(("arbitrary",)),
    )(a_prep, wt, mask)
    return y, st


# ----------------------------------------------------------------------------
# Training-mode BatchNorm: tiled partial stats -> tiny finalize -> tiled apply
# ----------------------------------------------------------------------------
def _bn_stats_kernel(y_ref, m_ref, st_ref):
    y = y_ref[...].astype(jnp.float32) * m_ref[...]
    st_ref[...] = jnp.concatenate(
        [jnp.sum(y, axis=0, keepdims=True),
         jnp.sum(y * y, axis=0, keepdims=True)], axis=0)[None]


def bn_stats(y, mask):
    rows, c = y.shape
    rt = _ROW_TILE if rows % _ROW_TILE == 0 else rows
    nt = rows // rt
    return pl.pallas_call(
        _bn_stats_kernel,
        out_shape=jax.ShapeDtypeStruct((nt, 2, c), jnp.float32),
        grid=(nt,),
        in_specs=[pl.BlockSpec((rt, c), lambda i: (i, 0)),
                  pl.BlockSpec((rt, 1), lambda i: (i, 0))],
        out_specs=pl.BlockSpec((1, 2, c), lambda i: (i, 0, 0)),
        compiler_params=_cp(("parallel",)),
    )(y, mask)


def _bn_finalize_kernel(st_ref, g_ref, b_ref, ss_ref, *, count):
    s = jnp.sum(st_ref[...], axis=0)                       # (2, C)
    mean = s[0:1, :] * (1.0 / count)
    var = jnp.maximum(s[1:2, :] * (1.0 / count) - mean * mean, 0.0)  # biased
    scale = g_ref[...] * jax.lax.rsqrt(var + _BN_EPS)
    shift = b_ref[...] - mean * scale
    ss_ref[...] = jnp.concatenate([scale, shift], axis=0)


def bn_finalize(st, gamma, beta, count):
    c = st.shape[-1]
    return pl.pallas_call(
        functools.partial(_bn_finalize_kernel, count=float(count)),
        out_shape=jax.ShapeDtypeStruct((2, c), jnp.float32),
        in_specs=[pl.BlockSpec(memory_space=pltpu.MemorySpace.VMEM)] * 3,
        out_specs=pl.BlockSpec(memory_space=pltpu.MemorySpace.VMEM),
        compiler_params=pltpu.CompilerParams(vmem_limit_bytes=_VMEM_LIMIT),
    )(st, gamma, beta)


def _bn_apply_kernel(*refs, relu, has_residual):
    if has_residual:
        y_ref, ss_ref, m_ref, r_ref, z_ref = refs
    else:
        y_ref, ss_ref, m_ref, z_ref = refs
        r_ref = None
    z = y_ref[...].astype(jnp.float32) * ss_ref[0:1, :] + ss_ref[1:2, :]
    if has_residual:
        z = z + r_ref[...].astype(jnp.float32)
    if relu:
        z = jnp.maximum(z, 0.0)
    # masking re-establishes the zero pad ring required by the next direct conv
    z_ref[...] = (z * m_ref[...]).astype(z_ref.dtype)


def bn_apply(y, ss, mask, residual=None, relu=True, out_dtype=jnp.bfloat16):
    rows, c = y.shape
    rt = _ROW_TILE if rows % _ROW_TILE == 0 else rows
    nt = rows // rt
    in_specs = [pl.BlockSpec((rt, c), lambda i: (i, 0)),
                pl.BlockSpec((2, c), lambda i: (0, 0)),
                pl.BlockSpec((rt, 1), lambda i: (i, 0))]
    args = [y, ss, mask]
    if residual is not None:
        in_specs.append(pl.BlockSpec((rt, c), lambda i: (i, 0)))
        args.append(residual)
    kern = functools.partial(_bn_apply_kernel, relu=relu,
                             has_residual=residual is not None)
    return pl.pallas_call(
        kern,
        out_shape=jax.ShapeDtypeStruct((rows, c), out_dtype),
        grid=(nt,),
        in_specs=in_specs,
        out_specs=pl.BlockSpec((rt, c), lambda i: (i, 0)),
        compiler_params=_cp(("parallel",)),
    )(*args)


# ----------------------------------------------------------------------------
# im2col conv (stem 7x7 s2 and the three 3x3 stride-2 convs only)
# ----------------------------------------------------------------------------
def conv_im2col(x, w, *, stride, padding):
    # TODO(synk): im2col still inflates HBM traffic by KH*KW for these few
    # stride-2 convs; a phase-decomposed variant of the direct tap kernel
    # would remove it.
    n, _, _, cin = x.shape
    kh_, kw_, _, cout = w.shape
    if padding:
        x = jnp.pad(x, ((0, 0), (padding, padding), (padding, padding), (0, 0)))
    hp, wp = x.shape[1], x.shape[2]
    oh = (hp - kh_) // stride + 1
    ow = (wp - kw_) // stride + 1
    taps = [jax.lax.slice(x, (0, kh, kw, 0),
                          (n, kh + (oh - 1) * stride + 1,
                           kw + (ow - 1) * stride + 1, cin),
                          (1, stride, stride, 1))
            for kh in range(kh_) for kw in range(kw_)]
    a = jnp.stack(taps, axis=3).reshape(n * oh * ow, kh_ * kw_ * cin)
    y = matmul_rows(a, w.reshape(kh_ * kw_ * cin, cout), out_dtype=jnp.bfloat16)
    return y, n * oh * ow, oh, ow


# ----------------------------------------------------------------------------
# Pooling and FC
# ----------------------------------------------------------------------------
def _max_kernel(x_ref, o_ref):
    o_ref[...] = jnp.max(x_ref[...], axis=0)


def max_pool_3x3_s2_p1(x):
    # TODO(synk): still materializes 9 shifted taps in HBM for this single stem
    # op; a halo-DMA kernel (like conv3x3_s1) would avoid the ~9x read blowup.
    n, h, w_, c = x.shape
    oh = (h + 2 - 3) // 2 + 1
    ow = (w_ + 2 - 3) // 2 + 1
    xp = jnp.pad(x, ((0, 0), (1, 1), (1, 1), (0, 0)))   # post-ReLU >= 0 -> 0-pad ok
    taps = [jax.lax.slice(xp, (0, kh, kw, 0),
                          (n, kh + (oh - 1) * 2 + 1, kw + (ow - 1) * 2 + 1, c),
                          (1, 2, 2, 1))
            for kh in range(3) for kw in range(3)]
    s = jnp.stack(taps, axis=0).reshape(9, n * oh * ow, c)
    m = n * oh * ow
    mp, tm = _pick_row_tile(m)
    s = jnp.pad(s, ((0, 0), (0, mp - m), (0, 0)))
    out = pl.pallas_call(
        _max_kernel,
        out_shape=jax.ShapeDtypeStruct((mp, c), x.dtype),
        grid=(mp // tm,),
        in_specs=[pl.BlockSpec((9, tm, c), lambda i: (0, i, 0))],
        out_specs=pl.BlockSpec((tm, c), lambda i: (i, 0)),
        compiler_params=_cp(("parallel",)),
    )(s)
    return out[:m].reshape(n, oh, ow, c)


def _avgpool_kernel(x_ref, o_ref, *, count):
    o_ref[...] = jnp.sum(x_ref[...].astype(jnp.float32), axis=1,
                         keepdims=True) * (1.0 / count)


def global_avg_pool(x):
    n, h, w_, c = x.shape
    hw = h * w_
    hwp = _round_up(hw, 8)
    xr = jnp.pad(x.reshape(n, hw, c), ((0, 0), (0, hwp - hw), (0, 0)))
    out = pl.pallas_call(
        functools.partial(_avgpool_kernel, count=float(hw)),
        out_shape=jax.ShapeDtypeStruct((n, 1, c), jnp.float32),
        grid=(n,),
        in_specs=[pl.BlockSpec((1, hwp, c), lambda i: (i, 0, 0))],
        out_specs=pl.BlockSpec((1, 1, c), lambda i: (i, 0, 0)),
        compiler_params=_cp(("parallel",)),
    )(xr)
    return out.reshape(n, c)


def linear(x, w, b):
    nrows = x.shape[0]
    cout = w.shape[1]
    cp = _round_up(cout, 128)                    # lane-dense output stores
    wp = jnp.pad(w, ((0, 0), (0, cp - cout)))
    bp = jnp.pad(b, ((0, 0), (0, cp - cout)))
    y = matmul_rows(x, wp, bias=bp, out_dtype=jnp.float32)
    return y[:nrows, :cout]


# ----------------------------------------------------------------------------
# Model: parameter init + forward
# ----------------------------------------------------------------------------
def _init_conv(key, kh, kw, cin, cout):
    fan_in = kh * kw * cin
    return jax.random.normal(key, (kh, kw, cin, cout), jnp.float32) * (2.0 / fan_in) ** 0.5


def _init_block(key, cin, planes, stride):
    k = jax.random.split(key, 3)
    p = {
        "stride": stride,
        "w1": _init_conv(k[0], 3, 3, cin, planes),
        "g1": jnp.ones((1, planes), jnp.float32),
        "b1": jnp.zeros((1, planes), jnp.float32),
        "w2": _init_conv(k[1], 3, 3, planes, planes),
        "g2": jnp.ones((1, planes), jnp.float32),
        "b2": jnp.zeros((1, planes), jnp.float32),
        "downsample": None,
    }
    if stride != 1 or cin != planes:     # BasicBlock.expansion == 1
        # The PyTorch 1x1 downsample conv keeps bias=True, but it is followed by
        # training-mode BatchNorm which subtracts the batch mean, so the bias
        # cancels exactly; it is dropped here (no output change).
        p["downsample"] = {
            "w": _init_conv(k[2], 1, 1, cin, planes),
            "g": jnp.ones((1, planes), jnp.float32),
            "beta": jnp.zeros((1, planes), jnp.float32),
        }
    return p


def init_resnet(key, layer_list=(2, 2, 2, 2), num_classes=10, num_channels=3):
    keys = jax.random.split(key, 8)
    params = {
        "conv1_w": _init_conv(keys[0], 7, 7, num_channels, 64),
        "bn1_g": jnp.ones((1, 64), jnp.float32),
        "bn1_b": jnp.zeros((1, 64), jnp.float32),
        "layers": [],
    }
    in_ch = 64
    planes_list = (64, 128, 256, 512)
    strides = (1, 2, 2, 2)
    for li, (nblocks, planes, stride) in enumerate(zip(layer_list, planes_list, strides)):
        blk_keys = jax.random.split(keys[1 + li], nblocks)
        layer = []
        for bi in range(nblocks):
            s_ = stride if bi == 0 else 1
            layer.append(_init_block(blk_keys[bi], in_ch, planes, s_))
            in_ch = planes
        params["layers"].append(layer)
    params["fc_w"] = jax.random.normal(keys[5], (512, num_classes), jnp.float32) * (1.0 / 512.0) ** 0.5
    params["fc_b"] = jax.random.normal(keys[6], (1, num_classes), jnp.float32) * 0.01
    return params


def basic_block(g, p):
    n, oh, ow = g.n, g.oh, g.ow
    planes = p["w1"].shape[-1]

    if p["downsample"] is None:
        # stride-1 block: both convs via the direct tap kernel, residual add fused
        gmask = _grid_mask(n, oh, ow, g.rows.shape[0])
        y1, st1 = conv3x3_s1(g, p["w1"])
        ss1 = bn_finalize(st1, p["g1"], p["b1"], n * oh * ow)
        z1 = GridAct(bn_apply(y1, ss1, gmask, relu=True), n, oh, ow)
        y2, st2 = conv3x3_s1(z1, p["w2"])
        ss2 = bn_finalize(st2, p["g2"], p["b2"], n * oh * ow)
        out = bn_apply(y2, ss2, gmask, residual=g.rows, relu=True)
        return GridAct(out, n, oh, ow)

    # first block of a stage (spatial / channel change)
    cin = g.rows.shape[1]
    s = p["stride"]
    xd = from_grid(g)

    y1, m1, oh1, ow1 = conv_im2col(xd, p["w1"], stride=s, padding=1)
    dmask1 = _dense_mask(m1, y1.shape[0])
    ss1 = bn_finalize(bn_stats(y1, dmask1), p["g1"], p["b1"], m1)
    z1d = bn_apply(y1, ss1, dmask1, relu=True)
    z1 = to_grid(z1d[:m1].reshape(n, oh1, ow1, planes))

    y2, st2 = conv3x3_s1(z1, p["w2"])
    ss2 = bn_finalize(st2, p["g2"], p["b2"], m1)

    d = p["downsample"]
    xs = xd[:, ::s, ::s, :].reshape(n * oh1 * ow1, cin)
    yd = matmul_rows(xs, d["w"].reshape(cin, planes), out_dtype=jnp.bfloat16)
    dmaskd = _dense_mask(m1, yd.shape[0])
    ssd = bn_finalize(bn_stats(yd, dmaskd), d["g"], d["beta"], m1)
    idd = bn_apply(yd, ssd, dmaskd, relu=False)
    idg = to_grid(idd[:m1].reshape(n, oh1, ow1, planes))

    gmask1 = _grid_mask(n, oh1, ow1, y2.shape[0])
    out = bn_apply(y2, ss2, gmask1, residual=idg.rows, relu=True)
    return GridAct(out, n, oh1, ow1)


def resnet_forward(params, x_nchw):
    x = jnp.transpose(x_nchw, (0, 2, 3, 1)).astype(jnp.float32)   # NCHW -> NHWC
    n = x.shape[0]

    # stem: conv7x7/2 -> BN -> ReLU -> maxpool3x3/2
    y1, m1, oh1, ow1 = conv_im2col(x, params["conv1_w"], stride=2, padding=3)
    dmask = _dense_mask(m1, y1.shape[0])
    ss = bn_finalize(bn_stats(y1, dmask), params["bn1_g"], params["bn1_b"], m1)
    z1 = bn_apply(y1, ss, dmask, relu=True)
    z1d = z1[:m1].reshape(n, oh1, ow1, 64)
    g = to_grid(max_pool_3x3_s2_p1(z1d))

    for layer in params["layers"]:
        for blk in layer:
            g = basic_block(g, blk)

    feat = global_avg_pool(from_grid(g).astype(jnp.float32))      # [N, 512]
    return linear(feat, params["fc_w"], params["fc_b"])


if __name__ == "__main__":
    key = jax.random.PRNGKey(0)
    pkey, xkey = jax.random.split(key)
    params = init_resnet(pkey, layer_list=(2, 2, 2, 2), num_classes=10, num_channels=3)
    x = jax.random.normal(xkey, (2, 3, 16, 16), jnp.float32)      # NCHW, CIFAR-ish small
    out = resnet_forward(params, x)
    out = jax.block_until_ready(out)
    assert out.shape == (2, 10), out.shape
    assert bool(jnp.all(jnp.isfinite(out)))
    print("KERNEL_OK")
</pallas_src>

<mosaic_0001>
module attributes {stable_mosaic.version = 11 : i64} {
  func.func @_matmul_kernel(%arg0: i32, %arg1: i32, %arg2: memref<128x256xbf16, #tpu.memory_space<vmem>>, %arg3: memref<256x64xbf16, #tpu.memory_space<vmem>>, %arg4: memref<128x64xbf16, #tpu.memory_space<vmem>>, %arg5: memref<128x64xf32, #tpu.memory_space<vmem>>) attributes {dimension_semantics = [#tpu.dimension_semantics<parallel>, #tpu.dimension_semantics<arbitrary>], iteration_bounds = array<i64: 1, 1>, scalar_prefetch = 0 : i64, scratch_operands = 1 : i64, tpu.core_type = #tpu.core_type<tc>, window_params = [{transform_indices = @transform_0, window_bounds = array<i64: 128, 256>}, {transform_indices = @transform_1, window_bounds = array<i64: 256, 64>}, {transform_indices = @transform_2, window_bounds = array<i64: 128, 64>}]} {
    %c0_i32 = arith.constant 0 : i32
    %0 = arith.cmpi eq, %arg1, %c0_i32 : i32
    %1 = arith.extui %0 : i1 to i32
    %c0_i32_0 = arith.constant 0 : i32
    %2 = arith.cmpi ne, %1, %c0_i32_0 : i32
    scf.if %2 {
      %cst_10 = arith.constant 0.000000e+00 : f32
      %12 = vector.broadcast %cst_10 : f32 to vector<128x64xf32>
      %c0_11 = arith.constant 0 : index
      %c0_12 = arith.constant 0 : index
      %13 = vector.load %arg5[%c0_11, %c0_12] : memref<128x64xf32, #tpu.memory_space<vmem>>, vector<128x64xf32>
      tpu.vector_store %arg5[%c0_11, %c0_12], %12 {strides = array<i32>} : memref<128x64xf32, #tpu.memory_space<vmem>>, vector<128x64xf32>,
    } else {
    }
    %c0 = arith.constant 0 : index
    %c0_1 = arith.constant 0 : index
    %3 = vector.load %arg5[%c0, %c0_1] : memref<128x64xf32, #tpu.memory_space<vmem>>, vector<128x64xf32>
    %c0_2 = arith.constant 0 : index
    %c0_3 = arith.constant 0 : index
    %4 = vector.load %arg2[%c0_2, %c0_3] : memref<128x256xbf16, #tpu.memory_space<vmem>>, vector<128x256xbf16>
    %c0_4 = arith.constant 0 : index
    %c0_5 = arith.constant 0 : index
    %5 = vector.load %arg3[%c0_4, %c0_5] : memref<256x64xbf16, #tpu.memory_space<vmem>>, vector<256x64xbf16>
    %cst = arith.constant dense<0.000000e+00> : vector<128x64xf32>
    %6 = tpu.matmul %4, %5, %cst {dimension_numbers = #tpu.dot_dimension_numbers<[1], [0], [0], [1], [0, 0, 1, 1], [], []>} : vector<128x256xbf16>, vector<256x64xbf16>, vector<128x64xf32> -> vector<128x64xf32>
    %7 = arith.addf %3, %6 : vector<128x64xf32>
    %c0_6 = arith.constant 0 : index
    %c0_7 = arith.constant 0 : index
    %8 = vector.load %arg5[%c0_6, %c0_7] : memref<128x64xf32, #tpu.memory_space<vmem>>, vector<128x64xf32>
    tpu.vector_store %arg5[%c0_6, %c0_7], %7 {strides = array<i32>} : memref<128x64xf32, #tpu.memory_space<vmem>>, vector<128x64xf32>,
    %c0_i32_8 = arith.constant 0 : i32
    %9 = arith.cmpi eq, %arg1, %c0_i32_8 : i32
    %10 = arith.extui %9 : i1 to i32
    %c0_i32_9 = arith.constant 0 : i32
    %11 = arith.cmpi ne, %10, %c0_i32_9 : i32
    scf.if %11 {
      %c0_10 = arith.constant 0 : index
      %c0_11 = arith.constant 0 : index
      %12 = vector.load %arg5[%c0_10, %c0_11] : memref<128x64xf32, #tpu.memory_space<vmem>>, vector<128x64xf32>
      %13 = arith.truncf %12 : vector<128x64xf32> to vector<128x64xbf16>
      %c0_12 = arith.constant 0 : index
      %c0_13 = arith.constant 0 : index
      %14 = vector.load %arg4[%c0_12, %c0_13] : memref<128x64xbf16, #tpu.memory_space<vmem>>, vector<128x64xbf16>
      tpu.vector_store %arg4[%c0_12, %c0_13], %13 {strides = array<i32>} : memref<128x64xbf16, #tpu.memory_space<vmem>>, vector<128x64xbf16>,
    } else {
    }
    return
  }
  func.func @transform_0(%arg0: i32, %arg1: i32) -> (i32, i32) {
    %c0_i32 = arith.constant 0 : i32
    return %arg0, %arg1 : i32, i32
  }
  func.func @transform_1(%arg0: i32, %arg1: i32) -> (i32, i32) {
    %c0_i32 = arith.constant 0 : i32
    %c0_i32_0 = arith.constant 0 : i32
    return %arg1, %c0_i32 : i32, i32
  }
  func.func @transform_2(%arg0: i32, %arg1: i32) -> (i32, i32) {
    %c0_i32 = arith.constant 0 : i32
    %c0_i32_0 = arith.constant 0 : i32
    return %arg0, %c0_i32 : i32, i32
  }
}

</mosaic_0001>

<bundles_post_ra>
// kernel: tpu_custom_call.1
= control target key start
LH: loop header
LB: loop body
LE: loop exit
PB: predicated region body
PF: predicated region fallthrough
CT: control target
= control target key end

     0   :  { %vm16_vm0 = vcmask 523264   ;;  %v692_v32 = vmov 0.0   ;;  %vm486_vm1 = vcmask 519168   ;;  %s900_s1 = inlined_call_operand.vmem [shape: bf16[256,64], index: 1, kind: input, shape index: {}]   ;;  %s901_s0 = inlined_call_operand.vmem [shape: bf16[128,256], index: 0, kind: input, shape index: {}]   ;;  %s902_s2 = inlined_call_operand.vmem [shape: bf16[128,64], index: 2, kind: output, shape index: {}]  }
   0x1   :  { %v652_v0 = vld [vmem:[%s900_s1 + $0x40] sm:$0xff]   ;;  %v654_v2 = vld [vmem:[%s900_s1 + $0x48] sm:$0xff]   ;;  %v656_v4 = vld [vmem:[%s900_s1 + $0x50] sm:$0xff]   ;;  %17 = vst.msk [vmem:[#allocation2] sm:$0xff] %vm16_vm0, %v692_v32 }
   0x2   :  { %v653_v1 = vld [vmem:[%s900_s1] sm:$0xff]   ;;  %571 = vmatprep.subr.bf16.mxu0 %v652_v0  ;;  %635 = vmatprep.subr.bf16.mxu1 %v652_v0  ;;  %v655_v3 = vld [vmem:[%s900_s1 + $0x8] sm:$0xff]   ;;  %v657_v5 = vld [vmem:[%s900_s1 + $0x10] sm:$0xff]   ;;  %18 = vst.msk [vmem:[#allocation2 + $0x8] sm:$0xff] %vm16_vm0, %v692_v32 }
   0x3   :  { %572 = vmatpush3.bf16.msra.mxu0 %v653_v1  ;;  %643 = vmatpush3.bf16.msra.mxu1 %v653_v1  ;;  %v658_v6 = vld [vmem:[%s900_s1 + $0x58] sm:$0xff]   ;;  %v660_v8 = vld [vmem:[%s900_s1 + $0x60] sm:$0xff]   ;;  %v662_v10 = vld [vmem:[%s900_s1 + $0x68] sm:$0xff]   ;;  %19 = vst.msk [vmem:[#allocation2 + $0x10] sm:$0xff] %vm16_vm0, %v692_v32 }
   0x4   :  { %573 = vmatprep.subr.bf16.mxu0 %v654_v2  ;;  %636 = vmatprep.subr.bf16.mxu1 %v654_v2  ;;  %v659_v7 = vld [vmem:[%s900_s1 + $0x18] sm:$0xff]   ;;  %v661_v9 = vld [vmem:[%s900_s1 + $0x20] sm:$0xff]   ;;  %v663_v13 = vld [vmem:[%s900_s1 + $0x28] sm:$0xff]   ;;  %20 = vst.msk [vmem:[#allocation2 + $0x18] sm:$0xff] %vm16_vm0, %v692_v32 }
   0x5   :  { %v670_v11 = vld [vmem:[%s901_s0 + $0x4] ss:$8 sps:$4 sm:$0xff]   ;;  %v664_v14 = vld [vmem:[%s900_s1 + $0x70] sm:$0xff]   ;;  %v666_v16 = vld [vmem:[%s900_s1 + $0x78] sm:$0xff]   ;;  %21 = vst.msk [vmem:[#allocation2 + $0x20] sm:$0xff] %vm16_vm0, %v692_v32 }
   0x6   :  { %v673_v12 = vld [vmem:[%s901_s0 + $0x44] ss:$8 sps:$4 sm:$0xff]   ;;  %305 = vmatprep.mubr.bf16.mxu0 %v670_v11  ;;  %v665_v15 = vld [vmem:[%s900_s1 + $0x30] sm:$0xff]   ;;  %v667_v17 = vld [vmem:[%s900_s1 + $0x38] sm:$0xff]   ;;  %22 = vst.msk [vmem:[#allocation2 + $0x28] sm:$0xff] %vm16_vm0, %v692_v32 }
   0x7   :  { %574 = vmatpush3.bf16.msra.mxu0 %v655_v3  ;;  %644 = vmatpush3.bf16.msra.mxu1 %v655_v3  ;;  %v668_v18 = vld [vmem:[%s901_s0] ss:$8 sps:$4 sm:$0xff]   ;;  %v674_v20 = vld [vmem:[%s901_s0 + $0x14] ss:$8 sps:$4 sm:$0xff]   ;;  %v678_v22 = vld [vmem:[%s901_s0 + $0x10] ss:$8 sps:$4 sm:$0xff]  }
   0x8   :  { %575 = vmatprep.subr.bf16.mxu0 %v656_v4  ;;  %637 = vmatprep.subr.bf16.mxu1 %v656_v4  ;;  %v671_v19 = vld [vmem:[%s901_s0 + $0x40] ss:$8 sps:$4 sm:$0xff]   ;;  %v676_v21 = vld [vmem:[%s901_s0 + $0x54] ss:$8 sps:$4 sm:$0xff]   ;;  %v679_v23 = vld [vmem:[%s901_s0 + $0x50] ss:$8 sps:$4 sm:$0xff]  }
   0x9   :  { %337 = vmatprep.mubr.bf16.mxu1 %v673_v12  ;;  %v680_v24 = vld [vmem:[%s901_s0 + $0x24] ss:$8 sps:$4 sm:$0xff]   ;;  %v684_v26 = vld [vmem:[%s901_s0 + $0x20] ss:$8 sps:$4 sm:$0xff]   ;;  %v686_v28 = vld [vmem:[%s901_s0 + $0x34] ss:$8 sps:$4 sm:$0xff]  }
   0xa   :  { %v682_v25 = vld [vmem:[%s901_s0 + $0x64] ss:$8 sps:$4 sm:$0xff]   ;;  %v685_v27 = vld [vmem:[%s901_s0 + $0x60] ss:$8 sps:$4 sm:$0xff]   ;;  %v688_v29 = vld [vmem:[%s901_s0 + $0x74] ss:$8 sps:$4 sm:$0xff]  }
   0xb   :  { %576 = vmatpush3.bf16.msra.mxu0 %v657_v5  ;;  %645 = vmatpush3.bf16.msra.mxu1 %v657_v5  ;;  %v690_v30 = vld [vmem:[%s901_s0 + $0x30] ss:$8 sps:$4 sm:$0xff]   ;;  %23 = vst.msk [vmem:[#allocation2 + $0x30] sm:$0xff] %vm16_vm0, %v692_v32  ;;  %24 = vst.msk [vmem:[#allocation2 + $0x38] sm:$0xff] %vm16_vm0, %v692_v32  ;;  %v33_v35 = vld [vmem:[#allocation2] sm:$0xff] }
   0xc   :  { %577 = vmatprep.subr.bf16.mxu0 %v658_v6  ;;  %638 = vmatprep.subr.bf16.mxu1 %v658_v6  ;;  %v691_v31 = vld [vmem:[%s901_s0 + $0x70] ss:$8 sps:$4 sm:$0xff]   ;;  %25 = vst.msk [vmem:[#allocation2 + $0x40] sm:$0xff] %vm16_vm0, %v692_v32  ;;  %26 = vst.msk [vmem:[#allocation2 + $0x48] sm:$0xff] %vm16_vm0, %v692_v32  ;;  %v34_v43 = vld [vmem:[#allocation2 + $0x8] sm:$0xff] }
   0xd   :  { %27 = vst.msk [vmem:[#allocation2 + $0x50] sm:$0xff] %vm16_vm0, %v692_v32  ;;  %28 = vst.msk [vmem:[#allocation2 + $0x58] sm:$0xff] %vm16_vm0, %v692_v32  ;;  %v35_v55 = vld [vmem:[#allocation2 + $0x10] sm:$0xff]  ;;  %v36_v63 = vld [vmem:[#allocation2 + $0x18] sm:$0xff] }
   0xe   :  { %29 = vst.msk [vmem:[#allocation2 + $0x60] sm:$0xff] %vm16_vm0, %v692_v32  ;;  %30 = vst.msk [vmem:[#allocation2 + $0x68] sm:$0xff] %vm16_vm0, %v692_v32 }
   0xf   :  { %578 = vmatpush3.bf16.msra.mxu0 %v659_v7  ;;  %646 = vmatpush3.bf16.msra.mxu1 %v659_v7  ;;  %31 = vst.msk [vmem:[#allocation2 + $0x70] sm:$0xff] %vm16_vm0, %v692_v32  ;;  %32 = vst.msk [vmem:[#allocation2 + $0x78] sm:$0xff] %vm16_vm0, %v692_v32 }
  0x10   :  { %579 = vmatprep.subr.bf16.mxu0 %v660_v8  ;;  %639 = vmatprep.subr.bf16.mxu1 %v660_v8 }
  0x13   :  { %580 = vmatpush3.bf16.msra.mxu0 %v661_v9  ;;  %647 = vmatpush3.bf16.msra.mxu1 %v661_v9  ;;  %v41_v37 = vld [vmem:[#allocation2 + $0x40] sm:$0xff]  ;;  %v42_v45 = vld [vmem:[#allocation2 + $0x48] sm:$0xff] }
  0x14   :  { %581 = vmatprep.subr.bf16.mxu0 %v662_v10  ;;  %640 = vmatprep.subr.bf16.mxu1 %v662_v10  ;;  %v43_v57 = vld [vmem:[#allocation2 + $0x50] sm:$0xff]  ;;  %v44_v1 = vld [vmem:[#allocation2 + $0x58] sm:$0xff] }
  0x17   :  { %582 = vmatpush3.bf16.msra.mxu0 %v663_v13  ;;  %648 = vmatpush3.bf16.msra.mxu1 %v663_v13 }
  0x18   :  { %583 = vmatprep.subr.bf16.mxu0 %v664_v14  ;;  %641 = vmatprep.subr.bf16.mxu1 %v664_v14 }
  0x1b   :  { %584 = vmatpush3.bf16.msra.mxu0 %v665_v15  ;;  %649 = vmatpush3.bf16.msra.mxu1 %v665_v15 }
  0x1c   :  { %585 = vmatprep.subr.bf16.mxu0 %v666_v16  ;;  %642 = vmatprep.subr.bf16.mxu1 %v666_v16 }
  0x1f   :  { %586 = vmatpush3.bf16.msra.mxu0 %v667_v17  ;;  %650 = vmatpush3.bf16.msra.mxu1 %v667_v17 }
  0x22   :  { %306 = vmatmul.mubr.bf16.vlgmr.msra.gmra.mrb[0].mxu0 %v668_v18  ;;  %338 = vmatmul.mubr.bf16.vlgmr.msra.gmra.mrb[0].mxu1 %v671_v19  ;;  %v37_v19 = vld [vmem:[#allocation2 + $0x20] sm:$0xff] }
  0x23   :  { %313 = vmatprep.mubr.bf16.mxu0 %v674_v20  ;;  %345 = vmatprep.mubr.bf16.mxu1 %v676_v21  ;;  %v45_v21 = vld [vmem:[#allocation2 + $0x60] sm:$0xff] }
  0x2a   :  { %314 = vmatmul.mubr.bf16.gmra.mrb[4].mxu0 %v678_v22  ;;  %346 = vmatmul.mubr.bf16.gmra.mrb[4].mxu1 %v679_v23 }
  0x2b   :  { %321 = vmatprep.mubr.bf16.mxu0 %v680_v24  ;;  %353 = vmatprep.mubr.bf16.mxu1 %v682_v25 }
  0x32   :  { %322 = vmatmul.mubr.bf16.gmra.mrb[8].mxu0 %v684_v26  ;;  %354 = vmatmul.mubr.bf16.gmra.mrb[8].mxu1 %v685_v27  ;;  %v38_v27 = vld [vmem:[#allocation2 + $0x28] sm:$0xff] }
  0x33   :  { %329 = vmatprep.mubr.bf16.mxu0 %v686_v28  ;;  %361 = vmatprep.mubr.bf16.mxu1 %v688_v29  ;;  %v46_v29 = vld [vmem:[#allocation2 + $0x68] sm:$0xff] }
  0x3a   :  { %330 = vmatmul.mubr.bf16.gmra.mrb[12].mxu0 %v690_v30  ;;  %362 = vmatmul.mubr.bf16.gmra.mrb[12].mxu1 %v691_v31 }
  0xf5   :  { %v587_v33 = vpop.f32.mrb[0].mxu0  ;;  %v611_v34 = vpop.f32.mrb[0].mxu1 }
  0xf6   :  { %v588_v36 = vpop.f32.mrb[1].mxu0  ;;  %v612_v38 = vpop.f32.mrb[1].mxu1 }
  0xf7   :  { %v589_v39 = vadd.f32 %v588_v36, %v587_v33  ;;  %v613_v40 = vadd.f32 %v612_v38, %v611_v34  ;;  %v590_v41 = vpop.f32.mrb[2].mxu0  ;;  %v614_v42 = vpop.f32.mrb[2].mxu1 }
  0xf8   :  { %v591_v44 = vpop.f32.mrb[3].mxu0  ;;  %v615_v46 = vpop.f32.mrb[3].mxu1 }
  0xf9   :  { %v370_v47 = vadd.f32 %v589_v39, %v33_v35  ;;  %v378_v48 = vadd.f32 %v613_v40, %v41_v37  ;;  %v592_v49 = vadd.f32 %v591_v44, %v590_v41  ;;  %v616_v50 = vadd.f32 %v615_v46, %v614_v42 }
  0xfb   :  { %387 = vst.msk [vmem:[#allocation2] sm:$0xff] %vm16_vm0, %v370_v47  ;;  %395 = vst.msk [vmem:[#allocation2 + $0x40] sm:$0xff] %vm16_vm0, %v378_v48  ;;  %v371_v51 = vadd.f32 %v592_v49, %v34_v43  ;;  %v379_v52 = vadd.f32 %v616_v50, %v42_v45  ;;  %v39_v47 = vld [vmem:[#allocation2 + $0x30] sm:$0xff] }
  0xfc   :  { %v47_v49 = vld [vmem:[#allocation2 + $0x70] sm:$0xff] }
  0xfd   :  { %388 = vst.msk [vmem:[#allocation2 + $0x8] sm:$0xff] %vm16_vm0, %v371_v51  ;;  %396 = vst.msk [vmem:[#allocation2 + $0x48] sm:$0xff] %vm16_vm0, %v379_v52  ;;  %v593_v53 = vpop.f32.mrb[4].mxu0  ;;  %v617_v54 = vpop.f32.mrb[4].mxu1 }
  0xfe   :  { %v594_v56 = vpop.f32.mrb[5].mxu0  ;;  %v618_v58 = vpop.f32.mrb[5].mxu1 }
  0xff   :  { %v595_v59 = vadd.f32 %v594_v56, %v593_v53  ;;  %v619_v60 = vadd.f32 %v618_v58, %v617_v54  ;;  %v596_v61 = vpop.f32.mrb[6].mxu0  ;;  %v620_v62 = vpop.f32.mrb[6].mxu1 }
 0x100   :  { %v597_v0 = vpop.f32.mrb[7].mxu0  ;;  %v621_v2 = vpop.f32.mrb[7].mxu1 }
 0x101   :  { %v372_v3 = vadd.f32 %v595_v59, %v35_v55  ;;  %v380_v4 = vadd.f32 %v619_v60, %v43_v57  ;;  %v598_v5 = vadd.f32 %v597_v0, %v596_v61  ;;  %v622_v6 = vadd.f32 %v621_v2, %v620_v62  ;;  %v40_v55 = vld [vmem:[#allocation2 + $0x38] sm:$0xff] }
 0x102   :  { %v406_v7 = vld [vmem:[#allocation2] sm:$0xff]  ;;  %v48_v57 = vld [vmem:[#allocation2 + $0x78] sm:$0xff] }
 0x103   :  { %v414_v8 = vld [vmem:[#allocation2 + $0x40] sm:$0xff]  ;;  %v555_v9 = vpack.c.bf16 %v406_v7, %v406_v7  ;;  %389 = vst.msk [vmem:[#allocation2 + $0x10] sm:$0xff] %vm16_vm0, %v372_v3  ;;  %397 = vst.msk [vmem:[#allocation2 + $0x50] sm:$0xff] %vm16_vm0, %v380_v4  ;;  %v373_v11 = vadd.f32 %v598_v5, %v36_v63  ;;  %v381_v12 = vadd.f32 %v622_v6, %v44_v1 }
 0x104   :  { %v563_v10 = vpack.c.bf16 %v414_v8, %v414_v8  ;;  %v407_v13 = vld [vmem:[#allocation2 + $0x8] sm:$0xff] }
 0x105   :  { %v415_v14 = vld [vmem:[#allocation2 + $0x48] sm:$0xff]  ;;  %487 = vst.msk [vmem:[%s902_s2] sm:$0xf] %vm486_vm1, %v555_v9  ;;  %v556_v15 = vpack.c.bf16 %v407_v13, %v407_v13  ;;  %v599_v17 = vpop.f32.mrb[8].mxu0  ;;  %v623_v18 = vpop.f32.mrb[8].mxu1 }
 0x106   :  { %495 = vst.msk [vmem:[%s902_s2 + $0x20] sm:$0xf] %vm486_vm1, %v563_v10  ;;  %v564_v16 = vpack.c.bf16 %v415_v14, %v415_v14  ;;  %v600_v20 = vpop.f32.mrb[9].mxu0  ;;  %v624_v22 = vpop.f32.mrb[9].mxu1 }
 0x107   :  { %390 = vst.msk [vmem:[#allocation2 + $0x18] sm:$0xff] %vm16_vm0, %v373_v11  ;;  %398 = vst.msk [vmem:[#allocation2 + $0x58] sm:$0xff] %vm16_vm0, %v381_v12  ;;  %v601_v23 = vadd.f32 %v600_v20, %v599_v17  ;;  %v625_v24 = vadd.f32 %v624_v22, %v623_v18  ;;  %v602_v25 = vpop.f32.mrb[10].mxu0  ;;  %v626_v26 = vpop.f32.mrb[10].mxu1 }
 0x108   :  { %488 = vst.msk [vmem:[%s902_s2 + $0x4] sm:$0xf] %vm486_vm1, %v556_v15  ;;  %496 = vst.msk [vmem:[%s902_s2 + $0x24] sm:$0xf] %vm486_vm1, %v564_v16  ;;  %v603_v28 = vpop.f32.mrb[11].mxu0  ;;  %v627_v30 = vpop.f32.mrb[11].mxu1 }
 0x109   :  { %v374_v31 = vadd.f32 %v601_v23, %v37_v19  ;;  %v382_v32 = vadd.f32 %v625_v24, %v45_v21  ;;  %v604_v33 = vadd.f32 %v603_v28, %v602_v25  ;;  %v628_v34 = vadd.f32 %v627_v30, %v626_v26 }
 0x10a   :  { %v408_v35 = vld [vmem:[#allocation2 + $0x10] sm:$0xff] }
 0x10b   :  { %v416_v36 = vld [vmem:[#allocation2 + $0x50] sm:$0xff]  ;;  %v557_v37 = vpack.c.bf16 %v408_v35, %v408_v35  ;;  %391 = vst.msk [vmem:[#allocation2 + $0x20] sm:$0xff] %vm16_vm0, %v374_v31  ;;  %399 = vst.msk [vmem:[#allocation2 + $0x60] sm:$0xff] %vm16_vm0, %v382_v32  ;;  %v375_v39 = vadd.f32 %v604_v33, %v38_v27  ;;  %v383_v40 = vadd.f32 %v628_v34, %v46_v29 }
 0x10c   :  { %v565_v38 = vpack.c.bf16 %v416_v36, %v416_v36 }
 0x10d   :  { %489 = vst.msk [vmem:[%s902_s2 + $0x8] sm:$0xf] %vm486_vm1, %v557_v37  ;;  %v605_v45 = vpop.f32.mrb[12].mxu0  ;;  %v629_v46 = vpop.f32.mrb[12].mxu1 }
 0x10e   :  { %v409_v41 = vld [vmem:[#allocation2 + $0x18] sm:$0xff]  ;;  %497 = vst.msk [vmem:[%s902_s2 + $0x28] sm:$0xf] %vm486_vm1, %v565_v38  ;;  %v606_v48 = vpop.f32.mrb[13].mxu0  ;;  %v630_v50 = vpop.f32.mrb[13].mxu1 }
 0x10f   :  { %v417_v42 = vld [vmem:[#allocation2 + $0x58] sm:$0xff]  ;;  %v558_v43 = vpack.c.bf16 %v409_v41, %v409_v41  ;;  %392 = vst.msk [vmem:[#allocation2 + $0x28] sm:$0xff] %vm16_vm0, %v375_v39  ;;  %400 = vst.msk [vmem:[#allocation2 + $0x68] sm:$0xff] %vm16_vm0, %v383_v40  ;;  %v607_v51 = vadd.f32 %v606_v48, %v605_v45  ;;  %v631_v52 = vadd.f32 %v630_v50, %v629_v46  ;;  %v608_v53 = vpop.f32.mrb[14].mxu0  ;;  %v632_v54 = vpop.f32.mrb[14].mxu1 }
 0x110   :  { %v566_v44 = vpack.c.bf16 %v417_v42, %v417_v42  ;;  %v609_v56 = vpop.f32.mrb[15].mxu0  ;;  %v633_v58 = vpop.f32.mrb[15].mxu1 }
 0x111   :  { %490 = vst.msk [vmem:[%s902_s2 + $0xc] sm:$0xf] %vm486_vm1, %v558_v43  ;;  %v376_v59 = vadd.f32 %v607_v51, %v39_v47  ;;  %v384_v60 = vadd.f32 %v631_v52, %v47_v49  ;;  %v610_v61 = vadd.f32 %v609_v56, %v608_v53  ;;  %v634_v62 = vadd.f32 %v633_v58, %v632_v54 }
 0x112   :  { %498 = vst.msk [vmem:[%s902_s2 + $0x2c] sm:$0xf] %vm486_vm1, %v566_v44  ;;  %v410_v63 = vld [vmem:[#allocation2 + $0x20] sm:$0xff] }
 0x113   :  { %v418_v0 = vld [vmem:[#allocation2 + $0x60] sm:$0xff]  ;;  %v559_v1 = vpack.c.bf16 %v410_v63, %v410_v63  ;;  %393 = vst.msk [vmem:[#allocation2 + $0x30] sm:$0xff] %vm16_vm0, %v376_v59  ;;  %401 = vst.msk [vmem:[#allocation2 + $0x70] sm:$0xff] %vm16_vm0, %v384_v60  ;;  %v377_v3 = vadd.f32 %v610_v61, %v40_v55  ;;  %v385_v4 = vadd.f32 %v634_v62, %v48_v57 }
 0x114   :  { %v567_v2 = vpack.c.bf16 %v418_v0, %v418_v0 }
 0x115   :  { %491 = vst.msk [vmem:[%s902_s2 + $0x10] sm:$0xf] %vm486_vm1, %v559_v1 }
 0x116   :  { %v411_v5 = vld [vmem:[#allocation2 + $0x28] sm:$0xff]  ;;  %499 = vst.msk [vmem:[%s902_s2 + $0x30] sm:$0xf] %vm486_vm1, %v567_v2 }
 0x117   :  { %v419_v6 = vld [vmem:[#allocation2 + $0x68] sm:$0xff]  ;;  %v560_v7 = vpack.c.bf16 %v411_v5, %v411_v5  ;;  %394 = vst.msk [vmem:[#allocation2 + $0x38] sm:$0xff] %vm16_vm0, %v377_v3  ;;  %402 = vst.msk [vmem:[#allocation2 + $0x78] sm:$0xff] %vm16_vm0, %v385_v4 }
 0x118   :  { %v568_v8 = vpack.c.bf16 %v419_v6, %v419_v6 }
 0x119   :  { %492 = vst.msk [vmem:[%s902_s2 + $0x14] sm:$0xf] %vm486_vm1, %v560_v7 }
 0x11a   :  { %500 = vst.msk [vmem:[%s902_s2 + $0x34] sm:$0xf] %vm486_vm1, %v568_v8  ;;  %v412_v9 = vld [vmem:[#allocation2 + $0x30] sm:$0xff] }
 0x11b   :  { %v420_v10 = vld [vmem:[#allocation2 + $0x70] sm:$0xff]  ;;  %v561_v11 = vpack.c.bf16 %v412_v9, %v412_v9 }
 0x11c   :  { %v569_v12 = vpack.c.bf16 %v420_v10, %v420_v10 }
 0x11d   :  { %493 = vst.msk [vmem:[%s902_s2 + $0x18] sm:$0xf] %vm486_vm1, %v561_v11 }
 0x11e   :  { %v413_v13 = vld [vmem:[#allocation2 + $0x38] sm:$0xff]  ;;  %501 = vst.msk [vmem:[%s902_s2 + $0x38] sm:$0xf] %vm486_vm1, %v569_v12 }
 0x11f   :  { %v421_v14 = vld [vmem:[#allocation2 + $0x78] sm:$0xff]  ;;  %v562_v15 = vpack.c.bf16 %v413_v13, %v413_v13 }
 0x120   :  { %v570_v16 = vpack.c.bf16 %v421_v14, %v421_v14 }
 0x121   :  { %494 = vst.msk [vmem:[%s902_s2 + $0x1c] sm:$0xf] %vm486_vm1, %v562_v15 }
 0x122   :  { %502 = vst.msk [vmem:[%s902_s2 + $0x3c] sm:$0xf] %vm486_vm1, %v570_v16 }

</bundles_post_ra>
